<compile_context>
chip_gen: v7x
topology: tpu7x:2x2x1
jax: 0.10.0
libtpu: 0.0.40
codegen_flags: <defaults>
</compile_context>

<pallas_src>
import functools
import math

import jax
import jax.numpy as jnp
from jax import lax
from jax.experimental import pallas as pl
from jax.experimental.pallas import tpu as pltpu


# --------------------------------------------------------------------------
# Kernel: one encoder layer, one (batch, q-tile, head) grid step.
# --------------------------------------------------------------------------
def _encoder_layer_kernel(
    xq_ref,    # (1, tS, D)  f32  query rows (also residual rows)
    xf_ref,    # (1, S,  D)  f32  full sequence (for K/V)
    wq_ref,    # (1, D, hd)  bf16 per-head Q weight
    wk_ref,    # (1, D, hd)  bf16
    wv_ref,    # (1, D, hd)  bf16
    bq_ref,    # (1, 1, hd)  f32
    bk_ref,    # (1, 1, hd)  f32
    bv_ref,    # (1, 1, hd)  f32
    wo_ref,    # (1, hd, D)  bf16 per-head slice of output projection
    bo_ref,    # (1, D)      f32
    g1_ref,    # (1, D)      f32  LayerNorm1 gamma
    be1_ref,   # (1, D)      f32  LayerNorm1 beta
    w1_ref,    # (D, F)      bf16 FFN linear1
    b1_ref,    # (1, F)      f32
    w2_ref,    # (F, D)      bf16 FFN linear2
    b2_ref,    # (1, D)      f32
    g2_ref,    # (1, D)      f32  LayerNorm2 gamma
    be2_ref,   # (1, D)      f32  LayerNorm2 beta
    o_ref,     # (1, tS, D)  f32
    acc_ref,   # (tS, D)     f32  VMEM scratch: accumulated attention output
    *,
    num_heads: int,
    head_dim: int,
):
    eps = 1e-5
    scale = 1.0 / math.sqrt(head_dim)
    h = pl.program_id(2)

    xq = xq_ref[0]                              # (tS, D) f32
    xq_bf = xq.astype(jnp.bfloat16)
    xf_bf = xf_ref[0].astype(jnp.bfloat16)      # (S, D)  bf16

    @pl.when(h == 0)
    def _init():
        acc_ref[...] = jnp.zeros_like(acc_ref)

    # ---- per-head attention (bf16 MXU, f32 accumulation) ----------------
    q = jnp.dot(xq_bf, wq_ref[0], preferred_element_type=jnp.float32) + bq_ref[0]  # (tS, hd)
    k = jnp.dot(xf_bf, wk_ref[0], preferred_element_type=jnp.float32) + bk_ref[0]  # (S,  hd)
    v = jnp.dot(xf_bf, wv_ref[0], preferred_element_type=jnp.float32) + bv_ref[0]  # (S,  hd)

    s = lax.dot_general(
        q.astype(jnp.bfloat16), k.astype(jnp.bfloat16),
        (((1,), (1,)), ((), ())),
        preferred_element_type=jnp.float32,
    ) * scale                                                                       # (tS, S)
    s = s - jnp.max(s, axis=-1, keepdims=True)
    p = jnp.exp(s)
    p = p * pl.reciprocal(jnp.sum(p, axis=-1, keepdims=True), approx=True)

    ctx = jnp.dot(p.astype(jnp.bfloat16), v.astype(jnp.bfloat16),
                  preferred_element_type=jnp.float32)                               # (tS, hd)

    # per-head slice of the output projection, summed over heads in f32
    acc_ref[...] += jnp.dot(ctx.astype(jnp.bfloat16), wo_ref[0],
                            preferred_element_type=jnp.float32)                     # (tS, D)

    # ---- finalize on the last head: residual+LN1, FFN, residual+LN2 ------
    @pl.when(h == num_heads - 1)
    def _finalize():
        attn_out = acc_ref[...] + bo_ref[...]
        # dropout1 -> identity (eval)
        h1 = attn_out + xq
        mu1 = jnp.mean(h1, axis=-1, keepdims=True)
        var1 = jnp.mean(jnp.square(h1 - mu1), axis=-1, keepdims=True)
        x1 = g1_ref[...] * ((h1 - mu1) * lax.rsqrt(var1 + eps)) + be1_ref[...]

        f = jnp.dot(x1.astype(jnp.bfloat16), w1_ref[...],
                    preferred_element_type=jnp.float32) + b1_ref[...]
        f = jnp.maximum(f, 0.0)          # ReLU (dropout inside FFN -> identity)
        f = jnp.dot(f.astype(jnp.bfloat16), w2_ref[...],
                    preferred_element_type=jnp.float32) + b2_ref[...]

        # dropout2 -> identity (eval)
        h2 = f + x1
        mu2 = jnp.mean(h2, axis=-1, keepdims=True)
        var2 = jnp.mean(jnp.square(h2 - mu2), axis=-1, keepdims=True)
        o_ref[0] = g2_ref[...] * ((h2 - mu2) * lax.rsqrt(var2 + eps)) + be2_ref[...]


# --------------------------------------------------------------------------
# Wrapper
# --------------------------------------------------------------------------
def _pick_seq_tile(S):
    if S % 256 == 0:
        return 256
    if S % 128 == 0:
        return 128
    return S


def _vmem_limit_bytes(S, tS, D, F, hd):
    f32, bf16 = 4, 2
    per_iter = (
        tS * D * f32 + S * D * f32                      # x q-tile + full x
        + 3 * (D * hd * bf16 + hd * f32)                # per-head QKV weights + biases
        + hd * D * bf16 + D * f32                       # wo head slice + bo
        + 4 * D * f32                                   # LN params
        + D * F * bf16 + F * f32 + F * D * bf16 + D * f32  # FFN
        + tS * D * f32                                  # out block
    )
    temporaries = tS * S * f32 * 4 + tS * F * f32 * 2 + tS * D * f32 * 6
    est = 2 * per_iter + tS * D * f32 + temporaries     # x2 for double buffering
    return int(min(max(2 * est, 32 * (1 << 20)), 128 * (1 << 20)))


def encoder_layer_pallas(x, params, *, num_heads):
    """Run one encoder layer. x: (B, S, D) float32 -> (B, S, D) float32."""
    B, S, D = x.shape
    F = params["w1"].shape[1]
    assert D % num_heads == 0
    hd = D // num_heads
    tS = _pick_seq_tile(S)
    num_qt = S // tS

    # Pre-split per-head weights in the wrapper (free layout plumbing).
    # Head h of Q/K/V = columns [h*hd:(h+1)*hd]; head h of O = rows [h*hd:(h+1)*hd].
    def split_cols(w):  # (D, D) -> (H, D, hd)
        return w.reshape(D, num_heads, hd).transpose(1, 0, 2)

    wq_h = split_cols(params["wq"])
    wk_h = split_cols(params["wk"])
    wv_h = split_cols(params["wv"])
    bq_h = params["bq"].reshape(num_heads, 1, hd)
    bk_h = params["bk"].reshape(num_heads, 1, hd)
    bv_h = params["bv"].reshape(num_heads, 1, hd)
    wo_h = params["wo"].reshape(num_heads, hd, D)

    def const(shape):
        return pl.BlockSpec(shape, lambda b, qi, h: tuple(0 for _ in shape))

    def per_head(shape):
        return pl.BlockSpec(shape, lambda b, qi, h: (h,) + tuple(0 for _ in shape[1:]))

    kernel = functools.partial(_encoder_layer_kernel,
                               num_heads=num_heads, head_dim=hd)

    return pl.pallas_call(
        kernel,
        out_shape=jax.ShapeDtypeStruct((B, S, D), jnp.float32),
        grid_spec=pltpu.PrefetchScalarGridSpec(
            num_scalar_prefetch=0,
            grid=(B, num_qt, num_heads),
            in_specs=[
                pl.BlockSpec((1, tS, D), lambda b, qi, h: (b, qi, 0)),  # x (query tile)
                pl.BlockSpec((1, S, D), lambda b, qi, h: (b, 0, 0)),    # x (full, K/V)
                per_head((1, D, hd)),                                   # wq_h
                per_head((1, D, hd)),                                   # wk_h
                per_head((1, D, hd)),                                   # wv_h
                per_head((1, 1, hd)),                                   # bq_h
                per_head((1, 1, hd)),                                   # bk_h
                per_head((1, 1, hd)),                                   # bv_h
                per_head((1, hd, D)),                                   # wo_h
                const((1, D)),                                          # bo
                const((1, D)),                                          # gamma1
                const((1, D)),                                          # beta1
                const((D, F)),                                          # w1
                const((1, F)),                                          # b1
                const((F, D)),                                          # w2
                const((1, D)),                                          # b2
                const((1, D)),                                          # gamma2
                const((1, D)),                                          # beta2
            ],
            out_specs=pl.BlockSpec((1, tS, D), lambda b, qi, h: (b, qi, 0)),
            scratch_shapes=[pltpu.VMEM((tS, D), jnp.float32)],
        ),
        compiler_params=pltpu.CompilerParams(
            dimension_semantics=("parallel", "parallel", "arbitrary"),
            vmem_limit_bytes=_vmem_limit_bytes(S, tS, D, F, hd),
        ),
    )(
        x, x,
        wq_h, wk_h, wv_h, bq_h, bk_h, bv_h,
        wo_h, params["bo"],
        params["gamma1"], params["beta1"],
        params["w1"], params["b1"],
        params["w2"], params["b2"],
        params["gamma2"], params["beta2"],
    )


# --------------------------------------------------------------------------
# Params / multi-layer driver / pure-JAX reference
# --------------------------------------------------------------------------
def init_layer_params(key, d_model, ffn_hidden):
    ks = jax.random.split(key, 12)

    def lin(k, fan_in, shape):
        return (jax.random.normal(k, shape, jnp.float32) / math.sqrt(fan_in)).astype(jnp.bfloat16)

    def small(k, shape):
        return 0.1 * jax.random.normal(k, shape, jnp.float32)

    return {
        "wq": lin(ks[0], d_model, (d_model, d_model)),
        "wk": lin(ks[1], d_model, (d_model, d_model)),
        "wv": lin(ks[2], d_model, (d_model, d_model)),
        "bq": small(ks[3], (1, d_model)),
        "bk": small(ks[4], (1, d_model)),
        "bv": small(ks[5], (1, d_model)),
        "wo": lin(ks[6], d_model, (d_model, d_model)),
        "bo": small(ks[7], (1, d_model)),
        "gamma1": jnp.ones((1, d_model), jnp.float32),
        "beta1": small(ks[8], (1, d_model)),
        "w1": lin(ks[9], d_model, (d_model, ffn_hidden)),
        "b1": small(ks[10], (1, ffn_hidden)),
        "w2": lin(ks[11], ffn_hidden, (ffn_hidden, d_model)),
        "b2": jnp.zeros((1, d_model), jnp.float32),
        "gamma2": jnp.ones((1, d_model), jnp.float32),
        "beta2": jnp.zeros((1, d_model), jnp.float32),
    }


def encoder_forward(x, layer_params_list, *, num_heads):
    """Matches Encoder.forward: returns (last_output, list_of_per_layer_outputs)."""
    attention_list = []
    attention_matrix = None
    for params in layer_params_list:
        attention_matrix = encoder_layer_pallas(x, params, num_heads=num_heads)
        attention_list.append(attention_matrix)
        x = attention_matrix
    return attention_matrix, attention_list


def encoder_layer_reference(x, p, *, num_heads):
    """Pure-JAX reference with the same bf16-matmul / f32-math strategy."""
    B, S, D = x.shape
    hd = D // num_heads
    bf, f32 = jnp.bfloat16, jnp.float32

    def proj(a, w, b):
        return jnp.einsum("bsd,de->bse", a.astype(bf), w,
                          preferred_element_type=f32) + b

    q = proj(x, p["wq"], p["bq"])
    k = proj(x, p["wk"], p["bk"])
    v = proj(x, p["wv"], p["bv"])

    def split(t):
        return t.reshape(B, S, num_heads, hd).transpose(0, 2, 1, 3)

    qh, kh, vh = split(q), split(k), split(v)
    s = jnp.einsum("bhqd,bhkd->bhqk", qh.astype(bf), kh.astype(bf),
                   preferred_element_type=f32) / math.sqrt(hd)
    s = s - jnp.max(s, axis=-1, keepdims=True)
    w = jnp.exp(s)
    w = w / jnp.sum(w, axis=-1, keepdims=True)
    ctx = jnp.einsum("bhqk,bhkd->bhqd", w.astype(bf), vh.astype(bf),
                     preferred_element_type=f32)
    ctx = ctx.transpose(0, 2, 1, 3).reshape(B, S, D)
    attn_out = jnp.einsum("bsd,de->bse", ctx.astype(bf), p["wo"],
                          preferred_element_type=f32) + p["bo"]

    def ln(t, g, b):
        mu = jnp.mean(t, -1, keepdims=True)
        var = jnp.mean(jnp.square(t - mu), -1, keepdims=True)
        return g * ((t - mu) / jnp.sqrt(var + 1e-5)) + b

    x1 = ln(attn_out + x, p["gamma1"], p["beta1"])
    f = jnp.maximum(jnp.einsum("bsd,df->bsf", x1.astype(bf), p["w1"],
                               preferred_element_type=f32) + p["b1"], 0.0)
    f = jnp.einsum("bsf,fd->bsd", f.astype(bf), p["w2"],
                   preferred_element_type=f32) + p["b2"]
    return ln(f + x1, p["gamma2"], p["beta2"])


if __name__ == "__main__":
    # Small deterministic config: batch=2, seq=8, d_model=32, heads=4,
    # ffn_hidden=64, num_layers=2, drop_prob ignored (eval mode).
    B, S, d_model, num_heads, ffn_hidden, num_layers = 2, 8, 32, 4, 64, 2

    root = jax.random.PRNGKey(0)
    kx, kp = jax.random.split(root)
    x = jax.random.normal(kx, (B, S, d_model), jnp.float32)

    layer_keys = jax.random.split(kp, num_layers)
    layer_params = [init_layer_params(k, d_model, ffn_hidden) for k in layer_keys]

    out, out_list = encoder_forward(x, layer_params, num_heads=num_heads)
    out = jax.block_until_ready(out)
    for o in out_list:
        jax.block_until_ready(o)

    # Reference check (same bf16 matmul strategy; loose tol for approx recip).
    ref = x
    for p in layer_params:
        ref = encoder_layer_reference(ref, p, num_heads=num_heads)
    max_err = float(jnp.max(jnp.abs(out - ref)))

    assert out.shape == (B, S, d_model)
    assert len(out_list) == num_layers
    assert bool(jnp.all(jnp.isfinite(out)))
    assert max_err < 5e-2, f"max abs err vs reference = {max_err}"
    print("KERNEL_OK")
</pallas_src>

<mosaic_0001>
module attributes {stable_mosaic.version = 11 : i64} {
  func.func @_encoder_layer_kernel(%arg0: i32, %arg1: i32, %arg2: i32, %arg3: memref<1x8x32xf32, #tpu.memory_space<vmem>>, %arg4: memref<1x8x32xf32, #tpu.memory_space<vmem>>, %arg5: memref<1x32x8xbf16, #tpu.memory_space<vmem>>, %arg6: memref<1x32x8xbf16, #tpu.memory_space<vmem>>, %arg7: memref<1x32x8xbf16, #tpu.memory_space<vmem>>, %arg8: memref<1x1x8xf32, #tpu.memory_space<vmem>>, %arg9: memref<1x1x8xf32, #tpu.memory_space<vmem>>, %arg10: memref<1x1x8xf32, #tpu.memory_space<vmem>>, %arg11: memref<1x8x32xbf16, #tpu.memory_space<vmem>>, %arg12: memref<1x32xf32, #tpu.memory_space<vmem>>, %arg13: memref<1x32xf32, #tpu.memory_space<vmem>>, %arg14: memref<1x32xf32, #tpu.memory_space<vmem>>, %arg15: memref<32x64xbf16, #tpu.memory_space<vmem>>, %arg16: memref<1x64xf32, #tpu.memory_space<vmem>>, %arg17: memref<64x32xbf16, #tpu.memory_space<vmem>>, %arg18: memref<1x32xf32, #tpu.memory_space<vmem>>, %arg19: memref<1x32xf32, #tpu.memory_space<vmem>>, %arg20: memref<1x32xf32, #tpu.memory_space<vmem>>, %arg21: memref<1x8x32xf32, #tpu.memory_space<vmem>>, %arg22: memref<8x32xf32, #tpu.memory_space<vmem>>) attributes {dimension_semantics = [#tpu.dimension_semantics<parallel>, #tpu.dimension_semantics<parallel>, #tpu.dimension_semantics<arbitrary>], iteration_bounds = array<i64: 2, 1, 4>, scalar_prefetch = 0 : i64, scratch_operands = 1 : i64, tpu.core_type = #tpu.core_type<tc>, window_params = [{transform_indices = @transform_0, window_bounds = array<i64: 1, 8, 32>}, {transform_indices = @transform_1, window_bounds = array<i64: 1, 8, 32>}, {transform_indices = @transform_2, window_bounds = array<i64: 1, 32, 8>}, {transform_indices = @transform_3, window_bounds = array<i64: 1, 32, 8>}, {transform_indices = @transform_4, window_bounds = array<i64: 1, 32, 8>}, {transform_indices = @transform_5, window_bounds = array<i64: 1, 1, 8>}, {transform_indices = @transform_6, window_bounds = array<i64: 1, 1, 8>}, {transform_indices = @transform_7, window_bounds = array<i64: 1, 1, 8>}, {transform_indices = @transform_8, window_bounds = array<i64: 1, 8, 32>}, {pipeline_mode = #tpu.pipeline_mode<synchronous>, transform_indices = @transform_9, window_bounds = array<i64: 1, 32>}, {pipeline_mode = #tpu.pipeline_mode<synchronous>, transform_indices = @transform_10, window_bounds = array<i64: 1, 32>}, {pipeline_mode = #tpu.pipeline_mode<synchronous>, transform_indices = @transform_11, window_bounds = array<i64: 1, 32>}, {pipeline_mode = #tpu.pipeline_mode<synchronous>, transform_indices = @transform_12, window_bounds = array<i64: 32, 64>}, {pipeline_mode = #tpu.pipeline_mode<synchronous>, transform_indices = @transform_13, window_bounds = array<i64: 1, 64>}, {pipeline_mode = #tpu.pipeline_mode<synchronous>, transform_indices = @transform_14, window_bounds = array<i64: 64, 32>}, {pipeline_mode = #tpu.pipeline_mode<synchronous>, transform_indices = @transform_15, window_bounds = array<i64: 1, 32>}, {pipeline_mode = #tpu.pipeline_mode<synchronous>, transform_indices = @transform_16, window_bounds = array<i64: 1, 32>}, {pipeline_mode = #tpu.pipeline_mode<synchronous>, transform_indices = @transform_17, window_bounds = array<i64: 1, 32>}, {transform_indices = @transform_18, window_bounds = array<i64: 1, 8, 32>}]} {
    %c0 = arith.constant 0 : index
    %c0_0 = arith.constant 0 : index
    %c0_1 = arith.constant 0 : index
    %0 = vector.load %arg3[%c0, %c0_0, %c0_1] : memref<1x8x32xf32, #tpu.memory_space<vmem>>, vector<1x8x32xf32>
    %1 = vector.shape_cast %0 : vector<1x8x32xf32> to vector<8x32xf32>
    %2 = arith.truncf %1 : vector<8x32xf32> to vector<8x32xbf16>
    %c0_2 = arith.constant 0 : index
    %c0_3 = arith.constant 0 : index
    %c0_4 = arith.constant 0 : index
    %3 = vector.load %arg4[%c0_2, %c0_3, %c0_4] : memref<1x8x32xf32, #tpu.memory_space<vmem>>, vector<1x8x32xf32>
    %4 = vector.shape_cast %3 : vector<1x8x32xf32> to vector<8x32xf32>
    %5 = arith.truncf %4 : vector<8x32xf32> to vector<8x32xbf16>
    %c0_i32 = arith.constant 0 : i32
    %6 = arith.cmpi eq, %arg2, %c0_i32 : i32
    %7 = arith.extui %6 : i1 to i32
    %c0_i32_5 = arith.constant 0 : i32
    %8 = arith.cmpi ne, %7, %c0_i32_5 : i32
    scf.if %8 {
      %cst_40 = arith.constant 0.000000e+00 : f32
      %58 = vector.broadcast %cst_40 : f32 to vector<8x32xf32>
      %c0_41 = arith.constant 0 : index
      %c0_42 = arith.constant 0 : index
      %59 = vector.load %arg22[%c0_41, %c0_42] : memref<8x32xf32, #tpu.memory_space<vmem>>, vector<8x32xf32>
      tpu.vector_store %arg22[%c0_41, %c0_42], %58 {strides = array<i32>} : memref<8x32xf32, #tpu.memory_space<vmem>>, vector<8x32xf32>,
    } else {
    }
    %c0_6 = arith.constant 0 : index
    %c0_7 = arith.constant 0 : index
    %c0_8 = arith.constant 0 : index
    %9 = vector.load %arg5[%c0_6, %c0_7, %c0_8] : memref<1x32x8xbf16, #tpu.memory_space<vmem>>, vector<1x32x8xbf16>
    %10 = vector.shape_cast %9 : vector<1x32x8xbf16> to vector<32x8xbf16>
    %cst = arith.constant dense<0.000000e+00> : vector<8x8xf32>
    %11 = tpu.matmul %2, %10, %cst {dimension_numbers = #tpu.dot_dimension_numbers<[1], [0], [0], [1], [0, 0, 1, 1], [], []>} : vector<8x32xbf16>, vector<32x8xbf16>, vector<8x8xf32> -> vector<8x8xf32>
    %c0_9 = arith.constant 0 : index
    %c0_10 = arith.constant 0 : index
    %c0_11 = arith.constant 0 : index
    %12 = vector.load %arg8[%c0_9, %c0_10, %c0_11] : memref<1x1x8xf32, #tpu.memory_space<vmem>>, vector<1x1x8xf32>
    %13 = vector.shape_cast %12 : vector<1x1x8xf32> to vector<1x8xf32>
    %14 = vector.broadcast %13 : vector<1x8xf32> to vector<8x8xf32>
    %15 = arith.addf %11, %14 : vector<8x8xf32>
    %c0_12 = arith.constant 0 : index
    %c0_13 = arith.constant 0 : index
    %c0_14 = arith.constant 0 : index
    %16 = vector.load %arg6[%c0_12, %c0_13, %c0_14] : memref<1x32x8xbf16, #tpu.memory_space<vmem>>, vector<1x32x8xbf16>
    %17 = vector.shape_cast %16 : vector<1x32x8xbf16> to vector<32x8xbf16>
    %cst_15 = arith.constant dense<0.000000e+00> : vector<8x8xf32>
    %18 = tpu.matmul %5, %17, %cst_15 {dimension_numbers = #tpu.dot_dimension_numbers<[1], [0], [0], [1], [0, 0, 1, 1], [], []>} : vector<8x32xbf16>, vector<32x8xbf16>, vector<8x8xf32> -> vector<8x8xf32>
    %c0_16 = arith.constant 0 : index
    %c0_17 = arith.constant 0 : index
    %c0_18 = arith.constant 0 : index
    %19 = vector.load %arg9[%c0_16, %c0_17, %c0_18] : memref<1x1x8xf32, #tpu.memory_space<vmem>>, vector<1x1x8xf32>
    %20 = vector.shape_cast %19 : vector<1x1x8xf32> to vector<1x8xf32>
    %21 = vector.broadcast %20 : vector<1x8xf32> to vector<8x8xf32>
    %22 = arith.addf %18, %21 : vector<8x8xf32>
    %c0_19 = arith.constant 0 : index
    %c0_20 = arith.constant 0 : index
    %c0_21 = arith.constant 0 : index
    %23 = vector.load %arg7[%c0_19, %c0_20, %c0_21] : memref<1x32x8xbf16, #tpu.memory_space<vmem>>, vector<1x32x8xbf16>
    %24 = vector.shape_cast %23 : vector<1x32x8xbf16> to vector<32x8xbf16>
    %cst_22 = arith.constant dense<0.000000e+00> : vector<8x8xf32>
    %25 = tpu.matmul %5, %24, %cst_22 {dimension_numbers = #tpu.dot_dimension_numbers<[1], [0], [0], [1], [0, 0, 1, 1], [], []>} : vector<8x32xbf16>, vector<32x8xbf16>, vector<8x8xf32> -> vector<8x8xf32>
    %c0_23 = arith.constant 0 : index
    %c0_24 = arith.constant 0 : index
    %c0_25 = arith.constant 0 : index
    %26 = vector.load %arg10[%c0_23, %c0_24, %c0_25] : memref<1x1x8xf32, #tpu.memory_space<vmem>>, vector<1x1x8xf32>
    %27 = vector.shape_cast %26 : vector<1x1x8xf32> to vector<1x8xf32>
    %28 = vector.broadcast %27 : vector<1x8xf32> to vector<8x8xf32>
    %29 = arith.addf %25, %28 : vector<8x8xf32>
    %30 = arith.truncf %15 : vector<8x8xf32> to vector<8x8xbf16>
    %31 = arith.truncf %22 : vector<8x8xf32> to vector<8x8xbf16>
    %cst_26 = arith.constant dense<0.000000e+00> : vector<8x8xf32>
    %32 = tpu.matmul %30, %31, %cst_26 {dimension_numbers = #tpu.dot_dimension_numbers<[1], [1], [0], [0], [0, 0, 1, 0], [], []>} : vector<8x8xbf16>, vector<8x8xbf16>, vector<8x8xf32> -> vector<8x8xf32>
    %cst_27 = arith.constant 0.353553385 : f32
    %33 = vector.broadcast %cst_27 : f32 to vector<8x8xf32>
    %34 = arith.mulf %32, %33 : vector<8x8xf32>
    %cst_28 = arith.constant dense<0xFF800000> : vector<8xf32>
    %35 = vector.multi_reduction <maximumf>, %34, %cst_28 [1] : vector<8x8xf32> to vector<8xf32>
    %36 = vector.shape_cast %35 : vector<8xf32> to vector<8x1xf32>
    %37 = vector.broadcast %36 : vector<8x1xf32> to vector<8x8xf32>
    %38 = arith.subf %34, %37 : vector<8x8xf32>
    %39 = math.exp %38 : vector<8x8xf32>
    %cst_29 = arith.constant dense<0.000000e+00> : vector<8xf32>
    %40 = vector.multi_reduction <add>, %39, %cst_29 [1] : vector<8x8xf32> to vector<8xf32>
    %41 = vector.shape_cast %40 : vector<8xf32> to vector<8x1xf32>
    %42 = tpu.reciprocal %41 {approx = true} : vector<8x1xf32> -> vector<8x1xf32>
    %43 = vector.broadcast %42 : vector<8x1xf32> to vector<8x8xf32>
    %44 = arith.mulf %39, %43 : vector<8x8xf32>
    %45 = arith.truncf %44 : vector<8x8xf32> to vector<8x8xbf16>
    %46 = arith.truncf %29 : vector<8x8xf32> to vector<8x8xbf16>
    %cst_30 = arith.constant dense<0.000000e+00> : vector<8x8xf32>
    %47 = tpu.matmul %45, %46, %cst_30 {dimension_numbers = #tpu.dot_dimension_numbers<[1], [0], [0], [1], [0, 0, 1, 1], [], []>} : vector<8x8xbf16>, vector<8x8xbf16>, vector<8x8xf32> -> vector<8x8xf32>
    %c0_31 = arith.constant 0 : index
    %c0_32 = arith.constant 0 : index
    %48 = vector.load %arg22[%c0_31, %c0_32] : memref<8x32xf32, #tpu.memory_space<vmem>>, vector<8x32xf32>
    %49 = arith.truncf %47 : vector<8x8xf32> to vector<8x8xbf16>
    %c0_33 = arith.constant 0 : index
    %c0_34 = arith.constant 0 : index
    %c0_35 = arith.constant 0 : index
    %50 = vector.load %arg11[%c0_33, %c0_34, %c0_35] : memref<1x8x32xbf16, #tpu.memory_space<vmem>>, vector<1x8x32xbf16>
    %51 = vector.shape_cast %50 : vector<1x8x32xbf16> to vector<8x32xbf16>
    %cst_36 = arith.constant dense<0.000000e+00> : vector<8x32xf32>
    %52 = tpu.matmul %49, %51, %cst_36 {dimension_numbers = #tpu.dot_dimension_numbers<[1], [0], [0], [1], [0, 0, 1, 1], [], []>} : vector<8x8xbf16>, vector<8x32xbf16>, vector<8x32xf32> -> vector<8x32xf32>
    %53 = arith.addf %48, %52 : vector<8x32xf32>
    %c0_37 = arith.constant 0 : index
    %c0_38 = arith.constant 0 : index
    %54 = vector.load %arg22[%c0_37, %c0_38] : memref<8x32xf32, #tpu.memory_space<vmem>>, vector<8x32xf32>
    tpu.vector_store %arg22[%c0_37, %c0_38], %53 {strides = array<i32>} : memref<8x32xf32, #tpu.memory_space<vmem>>, vector<8x32xf32>,
    %c3_i32 = arith.constant 3 : i32
    %55 = arith.cmpi eq, %arg2, %c3_i32 : i32
    %56 = arith.extui %55 : i1 to i32
    %c0_i32_39 = arith.constant 0 : i32
    %57 = arith.cmpi ne, %56, %c0_i32_39 : i32
    scf.if %57 {
      %c0_40 = arith.constant 0 : index
      %c0_41 = arith.constant 0 : index
      %58 = vector.load %arg22[%c0_40, %c0_41] : memref<8x32xf32, #tpu.memory_space<vmem>>, vector<8x32xf32>
      %c0_42 = arith.constant 0 : index
      %c0_43 = arith.constant 0 : index
      %59 = vector.load %arg12[%c0_42, %c0_43] : memref<1x32xf32, #tpu.memory_space<vmem>>, vector<1x32xf32>
      %60 = vector.broadcast %59 : vector<1x32xf32> to vector<8x32xf32>
      %61 = arith.addf %58, %60 : vector<8x32xf32>
      %62 = arith.addf %61, %1 : vector<8x32xf32>
      %cst_44 = arith.constant dense<0.000000e+00> : vector<8xf32>
      %63 = vector.multi_reduction <add>, %62, %cst_44 [1] : vector<8x32xf32> to vector<8xf32>
      %64 = vector.shape_cast %63 : vector<8xf32> to vector<8x1xf32>
      %cst_45 = arith.constant 3.200000e+01 : f32
      %65 = vector.broadcast %cst_45 : f32 to vector<8x1xf32>
      %66 = arith.divf %64, %65 : vector<8x1xf32>
      %67 = vector.broadcast %66 : vector<8x1xf32> to vector<8x32xf32>
      %68 = arith.subf %62, %67 : vector<8x32xf32>
      %69 = arith.mulf %68, %68 : vector<8x32xf32>
      %cst_46 = arith.constant dense<0.000000e+00> : vector<8xf32>
      %70 = vector.multi_reduction <add>, %69, %cst_46 [1] : vector<8x32xf32> to vector<8xf32>
      %71 = vector.shape_cast %70 : vector<8xf32> to vector<8x1xf32>
      %cst_47 = arith.constant 3.200000e+01 : f32
      %72 = vector.broadcast %cst_47 : f32 to vector<8x1xf32>
      %73 = arith.divf %71, %72 : vector<8x1xf32>
      %c0_48 = arith.constant 0 : index
      %c0_49 = arith.constant 0 : index
      %74 = vector.load %arg13[%c0_48, %c0_49] : memref<1x32xf32, #tpu.memory_space<vmem>>, vector<1x32xf32>
      %75 = vector.broadcast %66 : vector<8x1xf32> to vector<8x32xf32>
      %76 = arith.subf %62, %75 : vector<8x32xf32>
      %cst_50 = arith.constant 9.99999974E-6 : f32
      %77 = vector.broadcast %cst_50 : f32 to vector<8x1xf32>
      %78 = arith.addf %73, %77 : vector<8x1xf32>
      %79 = math.rsqrt %78 : vector<8x1xf32>
      %80 = vector.broadcast %79 : vector<8x1xf32> to vector<8x32xf32>
      %81 = arith.mulf %76, %80 : vector<8x32xf32>
      %82 = vector.broadcast %74 : vector<1x32xf32> to vector<8x32xf32>
      %83 = arith.mulf %82, %81 : vector<8x32xf32>
      %c0_51 = arith.constant 0 : index
      %c0_52 = arith.constant 0 : index
      %84 = vector.load %arg14[%c0_51, %c0_52] : memref<1x32xf32, #tpu.memory_space<vmem>>, vector<1x32xf32>
      %85 = vector.broadcast %84 : vector<1x32xf32> to vector<8x32xf32>
      %86 = arith.addf %83, %85 : vector<8x32xf32>
      %87 = arith.truncf %86 : vector<8x32xf32> to vector<8x32xbf16>
      %c0_53 = arith.constant 0 : index
      %c0_54 = arith.constant 0 : index
      %88 = vector.load %arg15[%c0_53, %c0_54] : memref<32x64xbf16, #tpu.memory_space<vmem>>, vector<32x64xbf16>
      %cst_55 = arith.constant dense<0.000000e+00> : vector<8x64xf32>
      %89 = tpu.matmul %87, %88, %cst_55 {dimension_numbers = #tpu.dot_dimension_numbers<[1], [0], [0], [1], [0, 0, 1, 1], [], []>} : vector<8x32xbf16>, vector<32x64xbf16>, vector<8x64xf32> -> vector<8x64xf32>
      %c0_56 = arith.constant 0 : index
      %c0_57 = arith.constant 0 : index
      %90 = vector.load %arg16[%c0_56, %c0_57] : memref<1x64xf32, #tpu.memory_space<vmem>>, vector<1x64xf32>
      %91 = vector.broadcast %90 : vector<1x64xf32> to vector<8x64xf32>
      %92 = arith.addf %89, %91 : vector<8x64xf32>
      %cst_58 = arith.constant 0.000000e+00 : f32
      %93 = vector.broadcast %cst_58 : f32 to vector<8x64xf32>
      %94 = arith.maximumf %92, %93 : vector<8x64xf32>
      %95 = arith.truncf %94 : vector<8x64xf32> to vector<8x64xbf16>
      %c0_59 = arith.constant 0 : index
      %c0_60 = arith.constant 0 : index
      %96 = vector.load %arg17[%c0_59, %c0_60] : memref<64x32xbf16, #tpu.memory_space<vmem>>, vector<64x32xbf16>
      %cst_61 = arith.constant dense<0.000000e+00> : vector<8x32xf32>
      %97 = tpu.matmul %95, %96, %cst_61 {dimension_numbers = #tpu.dot_dimension_numbers<[1], [0], [0], [1], [0, 0, 1, 1], [], []>} : vector<8x64xbf16>, vector<64x32xbf16>, vector<8x32xf32> -> vector<8x32xf32>
      %c0_62 = arith.constant 0 : index
      %c0_63 = arith.constant 0 : index
      %98 = vector.load %arg18[%c0_62, %c0_63] : memref<1x32xf32, #tpu.memory_space<vmem>>, vector<1x32xf32>
      %99 = vector.broadcast %98 : vector<1x32xf32> to vector<8x32xf32>
      %100 = arith.addf %97, %99 : vector<8x32xf32>
      %101 = arith.addf %100, %86 : vector<8x32xf32>
      %cst_64 = arith.constant dense<0.000000e+00> : vector<8xf32>
      %102 = vector.multi_reduction <add>, %101, %cst_64 [1] : vector<8x32xf32> to vector<8xf32>
      %103 = vector.shape_cast %102 : vector<8xf32> to vector<8x1xf32>
      %cst_65 = arith.constant 3.200000e+01 : f32
      %104 = vector.broadcast %cst_65 : f32 to vector<8x1xf32>
      %105 = arith.divf %103, %104 : vector<8x1xf32>
      %106 = vector.broadcast %105 : vector<8x1xf32> to vector<8x32xf32>
      %107 = arith.subf %101, %106 : vector<8x32xf32>
      %108 = arith.mulf %107, %107 : vector<8x32xf32>
      %cst_66 = arith.constant dense<0.000000e+00> : vector<8xf32>
      %109 = vector.multi_reduction <add>, %108, %cst_66 [1] : vector<8x32xf32> to vector<8xf32>
      %110 = vector.shape_cast %109 : vector<8xf32> to vector<8x1xf32>
      %cst_67 = arith.constant 3.200000e+01 : f32
      %111 = vector.broadcast %cst_67 : f32 to vector<8x1xf32>
      %112 = arith.divf %110, %111 : vector<8x1xf32>
      %c0_68 = arith.constant 0 : index
      %c0_69 = arith.constant 0 : index
      %113 = vector.load %arg19[%c0_68, %c0_69] : memref<1x32xf32, #tpu.memory_space<vmem>>, vector<1x32xf32>
      %114 = vector.broadcast %105 : vector<8x1xf32> to vector<8x32xf32>
      %115 = arith.subf %101, %114 : vector<8x32xf32>
      %cst_70 = arith.constant 9.99999974E-6 : f32
      %116 = vector.broadcast %cst_70 : f32 to vector<8x1xf32>
      %117 = arith.addf %112, %116 : vector<8x1xf32>
      %118 = math.rsqrt %117 : vector<8x1xf32>
      %119 = vector.broadcast %118 : vector<8x1xf32> to vector<8x32xf32>
      %120 = arith.mulf %115, %119 : vector<8x32xf32>
      %121 = vector.broadcast %113 : vector<1x32xf32> to vector<8x32xf32>
      %122 = arith.mulf %121, %120 : vector<8x32xf32>
      %c0_71 = arith.constant 0 : index
      %c0_72 = arith.constant 0 : index
      %123 = vector.load %arg20[%c0_71, %c0_72] : memref<1x32xf32, #tpu.memory_space<vmem>>, vector<1x32xf32>
      %124 = vector.broadcast %123 : vector<1x32xf32> to vector<8x32xf32>
      %125 = arith.addf %122, %124 : vector<8x32xf32>
      %c0_73 = arith.constant 0 : index
      %c0_74 = arith.constant 0 : index
      %c0_75 = arith.constant 0 : index
      %126 = vector.load %arg21[%c0_73, %c0_74, %c0_75] : memref<1x8x32xf32, #tpu.memory_space<vmem>>, vector<1x8x32xf32>
      %127 = vector.shape_cast %126 : vector<1x8x32xf32> to vector<8x32xf32>
      %128 = vector.shape_cast %125 : vector<8x32xf32> to vector<1x8x32xf32>
      tpu.vector_store %arg21[%c0_73, %c0_74, %c0_75], %128 {strides = array<i32>} : memref<1x8x32xf32, #tpu.memory_space<vmem>>, vector<1x8x32xf32>,
    } else {
    }
    return
  }
  func.func @transform_0(%arg0: i32, %arg1: i32, %arg2: i32) -> (i32, i32, i32) {
    %c0_i32 = arith.constant 0 : i32
    %c0_i32_0 = arith.constant 0 : i32
    return %arg0, %arg1, %c0_i32 : i32, i32, i32
  }
  func.func @transform_1(%arg0: i32, %arg1: i32, %arg2: i32) -> (i32, i32, i32) {
    %c0_i32 = arith.constant 0 : i32
    %c0_i32_0 = arith.constant 0 : i32
    %c0_i32_1 = arith.constant 0 : i32
    return %arg0, %c0_i32, %c0_i32_0 : i32, i32, i32
  }
  func.func @transform_2(%arg0: i32, %arg1: i32, %arg2: i32) -> (i32, i32, i32) {
    %c0_i32 = arith.constant 0 : i32
    %c0_i32_0 = arith.constant 0 : i32
    %c0_i32_1 = arith.constant 0 : i32
    return %arg2, %c0_i32, %c0_i32_0 : i32, i32, i32
  }
  func.func @transform_3(%arg0: i32, %arg1: i32, %arg2: i32) -> (i32, i32, i32) {
    %c0_i32 = arith.constant 0 : i32
    %c0_i32_0 = arith.constant 0 : i32
    %c0_i32_1 = arith.constant 0 : i32
    return %arg2, %c0_i32, %c0_i32_0 : i32, i32, i32
  }
  func.func @transform_4(%arg0: i32, %arg1: i32, %arg2: i32) -> (i32, i32, i32) {
    %c0_i32 = arith.constant 0 : i32
    %c0_i32_0 = arith.constant 0 : i32
    %c0_i32_1 = arith.constant 0 : i32
    return %arg2, %c0_i32, %c0_i32_0 : i32, i32, i32
  }
  func.func @transform_5(%arg0: i32, %arg1: i32, %arg2: i32) -> (i32, i32, i32) {
    %c0_i32 = arith.constant 0 : i32
    %c0_i32_0 = arith.constant 0 : i32
    %c0_i32_1 = arith.constant 0 : i32
    return %arg2, %c0_i32, %c0_i32_0 : i32, i32, i32
  }
  func.func @transform_6(%arg0: i32, %arg1: i32, %arg2: i32) -> (i32, i32, i32) {
    %c0_i32 = arith.constant 0 : i32
    %c0_i32_0 = arith.constant 0 : i32
    %c0_i32_1 = arith.constant 0 : i32
    return %arg2, %c0_i32, %c0_i32_0 : i32, i32, i32
  }
  func.func @transform_7(%arg0: i32, %arg1: i32, %arg2: i32) -> (i32, i32, i32) {
    %c0_i32 = arith.constant 0 : i32
    %c0_i32_0 = arith.constant 0 : i32
    %c0_i32_1 = arith.constant 0 : i32
    return %arg2, %c0_i32, %c0_i32_0 : i32, i32, i32
  }
  func.func @transform_8(%arg0: i32, %arg1: i32, %arg2: i32) -> (i32, i32, i32) {
    %c0_i32 = arith.constant 0 : i32
    %c0_i32_0 = arith.constant 0 : i32
    %c0_i32_1 = arith.constant 0 : i32
    return %arg2, %c0_i32, %c0_i32_0 : i32, i32, i32
  }
  func.func @transform_9(%arg0: i32, %arg1: i32, %arg2: i32) -> (i32, i32) {
    %c0_i32 = arith.constant 0 : i32
    %c0_i32_0 = arith.constant 0 : i32
    %c0_i32_1 = arith.constant 0 : i32
    return %c0_i32, %c0_i32_0 : i32, i32
  }
  func.func @transform_10(%arg0: i32, %arg1: i32, %arg2: i32) -> (i32, i32) {
    %c0_i32 = arith.constant 0 : i32
    %c0_i32_0 = arith.constant 0 : i32
    %c0_i32_1 = arith.constant 0 : i32
    return %c0_i32, %c0_i32_0 : i32, i32
  }
  func.func @transform_11(%arg0: i32, %arg1: i32, %arg2: i32) -> (i32, i32) {
    %c0_i32 = arith.constant 0 : i32
    %c0_i32_0 = arith.constant 0 : i32
    %c0_i32_1 = arith.constant 0 : i32
    return %c0_i32, %c0_i32_0 : i32, i32
  }
  func.func @transform_12(%arg0: i32, %arg1: i32, %arg2: i32) -> (i32, i32) {
    %c0_i32 = arith.constant 0 : i32
    %c0_i32_0 = arith.constant 0 : i32
    %c0_i32_1 = arith.constant 0 : i32
    return %c0_i32, %c0_i32_0 : i32, i32
  }
  func.func @transform_13(%arg0: i32, %arg1: i32, %arg2: i32) -> (i32, i32) {
    %c0_i32 = arith.constant 0 : i32
    %c0_i32_0 = arith.constant 0 : i32
    %c0_i32_1 = arith.constant 0 : i32
    return %c0_i32, %c0_i32_0 : i32, i32
  }
  func.func @transform_14(%arg0: i32, %arg1: i32, %arg2: i32) -> (i32, i32) {
    %c0_i32 = arith.constant 0 : i32
    %c0_i32_0 = arith.constant 0 : i32
    %c0_i32_1 = arith.constant 0 : i32
    return %c0_i32, %c0_i32_0 : i32, i32
  }
  func.func @transform_15(%arg0: i32, %arg1: i32, %arg2: i32) -> (i32, i32) {
    %c0_i32 = arith.constant 0 : i32
    %c0_i32_0 = arith.constant 0 : i32
    %c0_i32_1 = arith.constant 0 : i32
    return %c0_i32, %c0_i32_0 : i32, i32
  }
  func.func @transform_16(%arg0: i32, %arg1: i32, %arg2: i32) -> (i32, i32) {
    %c0_i32 = arith.constant 0 : i32
    %c0_i32_0 = arith.constant 0 : i32
    %c0_i32_1 = arith.constant 0 : i32
    return %c0_i32, %c0_i32_0 : i32, i32
  }
  func.func @transform_17(%arg0: i32, %arg1: i32, %arg2: i32) -> (i32, i32) {
    %c0_i32 = arith.constant 0 : i32
    %c0_i32_0 = arith.constant 0 : i32
    %c0_i32_1 = arith.constant 0 : i32
    return %c0_i32, %c0_i32_0 : i32, i32
  }
  func.func @transform_18(%arg0: i32, %arg1: i32, %arg2: i32) -> (i32, i32, i32) {
    %c0_i32 = arith.constant 0 : i32
    %c0_i32_0 = arith.constant 0 : i32
    return %arg0, %arg1, %c0_i32 : i32, i32, i32
  }
}

</mosaic_0001>

<bundles_post_ra>
// kernel: tpu_custom_call.1
= control target key start
LH: loop header
LB: loop body
LE: loop exit
PB: predicated region body
PF: predicated region fallthrough
CT: control target
= control target key end

     0   :  { %s2205_s0 = inlined_call_operand.vmem [shape: f32[2,8,32], index: 0, kind: input, shape index: {}]   ;;  %s2206_s1 = inlined_call_operand.vmem [shape: f32[2,8,32], index: 1, kind: input, shape index: {}]   ;;  %s2207_s2 = inlined_call_operand.vmem [shape: bf16[4,32,8], index: 2, kind: input, shape index: {}]   ;;  %s2208_s3 = inlined_call_operand.vmem [shape: bf16[4,32,8], index: 3, kind: input, shape index: {}]   ;;  %s2209_s4 = inlined_call_operand.vmem [shape: bf16[4,32,8], index: 4, kind: input, shape index: {}]   ;;  %s2210_s5 = inlined_call_operand.vmem [shape: f32[4,1,8], index: 5, kind: input, shape index: {}]   ;;  %s2211_s6 = inlined_call_operand.vmem [shape: f32[4,1,8], index: 6, kind: input, shape index: {}]   ;;  %s2212_s7 = inlined_call_operand.vmem [shape: f32[4,1,8], index: 7, kind: input, shape index: {}]   ;;  %s2213_s8 = inlined_call_operand.vmem [shape: bf16[4,8,32], index: 8, kind: input, shape index: {}]   ;;  %s2214_s9 = inlined_call_operand.vmem [shape: f32[1,32], index: 9, kind: input, shape index: {}]   ;;  %s2215_s10 = inlined_call_operand.vmem [shape: f32[1,32], index: 10, kind: input, shape index: {}]   ;;  %s2216_s11 = inlined_call_operand.vmem [shape: f32[1,32], index: 11, kind: input, shape index: {}]   ;;  %s2217_s12 = inlined_call_operand.vmem [shape: bf16[32,64], index: 12, kind: input, shape index: {}]   ;;  %s2218_s13 = inlined_call_operand.vmem [shape: f32[1,64], index: 13, kind: input, shape index: {}]   ;;  %s2219_s14 = inlined_call_operand.vmem [shape: bf16[64,32], index: 14, kind: input, shape index: {}]   ;;  %s2220_s15 = inlined_call_operand.vmem [shape: f32[1,32], index: 15, kind: input, shape index: {}]   ;;  %s2221_s16 = inlined_call_operand.vmem [shape: f32[1,32], index: 16, kind: input, shape index: {}]   ;;  %s2222_s17 = inlined_call_operand.vmem [shape: f32[1,32], index: 17, kind: input, shape index: {}]   ;;  %s2223_s18 = inlined_call_operand.hbm [shape: f32[2,8,32], index: 18, kind: output, shape index: {}]  }
   0x1   :  { %2238 = sst [smem:[#allocation18_spill]] %s2205_s0 }
   0x2   :  { %2239 = sst [smem:[#allocation19_spill]] %s2206_s1 }
   0x3   :  { %2240 = sst [smem:[#allocation20_spill]] %s2207_s2 }
   0x4   :  { %2241 = sst [smem:[#allocation21_spill]] %s2216_s11 }
   0x5   :  { %2242 = sst [smem:[#allocation22_spill]] %s2218_s13 }
   0x6   :  { %2243 = sst [smem:[#allocation23_spill]] %s2220_s15 }
   0x7   :  { %2244 = sst [smem:[#allocation24_spill]] %s2221_s16 }
   0x8   :  { %2245 = sst [smem:[#allocation25_spill]] %s2222_s17 }
   0x9   :  { %2246 = sst [smem:[#allocation26_spill]] %s2223_s18 }
   0xa   :  { %23 = vsyncpa [#allocation4], 0 }
   0xb   :  { %25 = vsyncpa [#allocation4 + $0x1], 0  ;;  %s1945_s27 = smov 0   ;;  %s1947_s28 = smov 0  }
   0xc   :  { %s1949_s29 = smov 0   ;;  %s1951_s30 = smov 0  }
   0xd   :  { %s1953_s0 = smov 0   ;;  %s1955_s19 = smov 0  }
   0xe   :  { %s1957_s1 = smov 0   ;;  %s1959_s20 = smov 0  }
   0xf LB: > { %2247 = sst [smem:[#allocation6_spill]] %s1814_s27  ;;  %s1513_s21 = sadd.s32 4294967295, %s1842_s20   ;;  %s1842_s20 = sphi %s1959_s20, %s31_s20   ;;  %s1838_s1 = sphi %s1957_s1, %s2284_s1   ;;  %s1834_s19 = sphi %s1955_s19, %s2283_s19   ;;  %s1830_s0 = sphi %s1953_s0, %s2282_s0   ;;  %s1826_s30 = sphi %s1951_s30, %s2281_s30   ;;  %s1822_s29 = sphi %s1949_s29, %s2280_s29   ;;  %s1818_s28 = sphi %s1947_s28, %s2279_s28   ;;  %s1814_s27 = sphi %s1945_s27, %s2278_s27  }
  0x10   : > { %2248 = sst [smem:[#allocation7_spill]] %s1818_s28  ;;  %s1514_s22 = sadd.s32 4294967294, %s1842_s20  }
  0x11   : > { %2249 = sst [smem:[#allocation8_spill]] %s1822_s29  ;;  %s43_s2 = sadd.s32 1, %s1834_s19 }
  0x12   : > { %2250 = sst [smem:[#allocation9_spill]] %s1830_s0  ;;  %p44_p0 = scmp.ge.s32.totalorder %s43_s2, 4 }
  0x13   : > { %2251 = sst [smem:[#allocation10_spill]] %s1834_s19  ;;  %s50_s23 = sadd.s32 1, %s1838_s1 }
  0x14   : > { %2252 = sst [smem:[#allocation11_spill]] %s1838_s1  ;;  %p494_p1 = scmp.ne.s32.totalorder %s1822_s29, %s1818_s28 }
  0x15   : > { %2253 = sst [smem:[#allocation12_spill]] %s1842_s20  ;;  %p495_p2 = scmp.eq.s32.totalorder %s1513_s21, 7 }
  0x16   : > { %s2286_s2 = smov (%p44_p0, %s43_s2), 0  ;;  %s2288_s23 = smov (!%p44_p0, %s50_s23), %s1838_s1 }
  0x17   : > { %2254 = sst [smem:[#allocation13_spill]] %s2286_s2  ;;  %p1994_p3 = por %p495_p2, %p494_p1 }
  0x18   : > { %p500_p4 = scmp.ne.s32.totalorder %s1818_s28, %s1814_s27  ;;  %p52_p5 = scmp.ge.s32.totalorder %s2288_s23, 2 }
  0x19   : > { %s2255_s24 = scalar_select %p1994_p3, 1, 0 }
  0x1a   : > { %p501_p6 = scmp.eq.s32.totalorder %s1514_s22, 7  ;;  %p1517_p7 = scmp.ge.s32.totalorder %s1842_s20, 1 }
  0x1b   : > { %2256 = sst [smem:[#allocation14_spill]] %s2255_s24  ;;  %p612_p8 = scmp.lt.s32.totalorder %s1842_s20, 9 }
  0x1c   : > { %s2290_s23 = smov (%p52_p5, %s2288_s23), 0  ;;  %p2004_p9 = por %p501_p6, %p500_p4 }
  0x1d   : > { %2257 = sst [smem:[#allocation15_spill]] %s2290_s23  ;;  %p613_p10 = pnand %p1517_p7, %p612_p8 }
  0x1e   : > { %s2258_s25 = scalar_select %p2004_p9, 1, 0 }
  0x1f   : > { %s479_s26 = ssub.s32 %s1838_s1, %s2290_s23  ;;  %s484_s21 = sadd.s32 1, %s1822_s29 }
  0x20   : > { %2259 = sst [smem:[#allocation16_spill]] %s2258_s25  ;;  %p482_p11 = scmp.eq.s32.totalorder %s479_s26, 0 }
  0x21   : > { %616 = sbr.rel (%p613_p10) target bundleno = 2346 (0x92a), region = 92  ;;  %s2233_s22 = sand.u32 (!%p613_p10), 1, %s1818_s28  }
  0x22   : > { %s2012_s2 = scalar_select %p482_p11, %s1822_s29, %s484_s21  }
  0x23   : > { %p700_p12 = scmp.lt.s32.totalorder (!%p613_p10), %s1830_s0, 1  ;;  %s2018_s19 = sshll.u32 (!%p613_p10), %s2233_s22, 3 }
  0x24   : > { %2260 = sst [smem:[#allocation17_spill]] %s2012_s2  ;;  %p711_p13 = scmp.lt.s32.totalorder (!%p613_p10), %s1826_s30, 3 }
  0x25   : > { %s2261_s1 = sld [smem:[#allocation18_spill]] (!%p613_p10)  ;;  %s2262_s18 = sld [smem:[#allocation19_spill]] (!%p613_p10) }
  0x26   : > { %s699_s23 = scalar_lea.vmem (!%p613_p10), [#allocation3], %s2018_s19  ;;  %p1528_p0 = scmp.ne.s32.totalorder (!%p613_p10), %s1826_s30, 0 }
  0x28   : > { %s701_s25 = scalar_select %p700_p12, %s1830_s0, 1 }
  0x29   : > { %s2023_s27 = scalar_select %p711_p13, %s1826_s30, 3 }
  0x2a   : > { %s1519_s26 = sshll.u32 %s701_s25, 3  ;;  %s2263_s25 = sld [smem:[#allocation20_spill]]  ;;  %vm748_vm0 = vcmask (!%p1528_p0), 261120   ;;  %v1844_v4 = vmov (!%p1528_p0), 0.0  }
  0x2b   : > { %s706_s2 = scalar_lea.vmem %s2261_s1, %s1519_s26  ;;  %s710_s22 = scalar_lea.vmem %s2262_s18, %s1519_s26  ;;  %749 = vst.msk [vmem:[#allocation2] sm:$0xff] (!%p1528_p0), %vm748_vm0, %v1844_v4 }
  0x2c   : > { %s1564_s24 = sshll.u32 %s2023_s27, 4  ;;  %s728_s17 = scalar_lea.vmem %s2210_s5, %s2023_s27  ;;  %v2036_v0 = vld [vmem:[%s706_s2] sm:$0xff] }
  0x2d   : > { %v742_v1 = vld [vmem:[%s710_s22] sm:$0xff]  ;;  %s720_s1 = scalar_lea.vmem %s2208_s3, %s1564_s24  ;;  %v741_v2 = vpack.c.bf16 %v2036_v0, %v2036_v0  ;;  %s2049_s28 = scalar_lea.vmem %s2209_s4, %s1564_s24 }
  0x2e   : > { %v743_v3 = vpack.c.bf16 %v742_v1, %v742_v1  ;;  %s731_s2 = scalar_lea.vmem %s2211_s6, %s2023_s27  ;;  %s734_s16 = scalar_lea.vmem %s2212_s7, %s2023_s27 }
  0x2f   : > { %s1527_s26 = sshll.u32 %s2023_s27, 2  ;;  %747 = sbr.rel (%p1528_p0) target bundleno = 54 (0x36), region = 96 }
  0x30   : > { %s715_s13 = scalar_lea.vmem %s2263_s25, %s1564_s24  ;;  %s2063_s25 = scalar_lea.vmem %s2213_s8, %s1527_s26 }
  0x36 PF: > { %v1728_v5 = vld [vmem:[%s720_s1] sm:$0xff]   ;;  %v1845_v6 = vmov 0.0   ;;  %v1729_v7 = vld [vmem:[%s720_s1 + $0x8] sm:$0xff]   ;;  %vm1846_vm1 = vmmov 0   ;;  %vm773_vm2 = vcmask 261120   ;;  %vm948_vm3 = vcmask 64512  }
  0x37   : > { %1598 = vmatprep.subr.bf16.mxu1 %v1845_v6  ;;  %1590 = vmatprep.subr.bf16.mxu0 %v1845_v6  ;;  %v1730_v8 = vld [vmem:[%s715_s13] sm:$0xff]   ;;  %v1731_v9 = vld [vmem:[%s715_s13 + $0x8] sm:$0xff]   ;;  %vm1012_vm4 = vcmask 1043456   ;;  %p1544_p1 = scmp.ne.s32.totalorder %s1826_s30, 3 }
  0x38   : > { %1599 = vmatpush3.bf16.msra.mxu1 %v1728_v5  ;;  %1602 = vmatprep.mubr.msk.bf16.mxu1 %vm1846_vm1, %v1845_v6  ;;  %v1533_v10 = vld [vmem:[%s731_s2] ss:$0 sm:$0xff]  ;;  %v1733_v26 = vld [vmem:[%s2049_s28 + $0x8] sm:$0xff]   ;;  %vm1848_vm5 = vmmov (!%p1544_p1), 0   ;;  %s2264_s1 = sld [smem:[#allocation21_spill]] (!%p1544_p1)  ;;  %s2265_s30 = sld [smem:[#allocation22_spill]] (!%p1544_p1) }
  0x39   : > { %1600 = vmatprep.subr.bf16.mxu1 %v1845_v6  ;;  %1594 = vmatprep.mubr.msk.bf16.mxu0 %vm1846_vm1, %v1845_v6  ;;  %v1529_v15 = vld [vmem:[%s728_s17] ss:$0 sm:$0xff]  ;;  %vm1259_vm6 = vcmask (!%p1544_p1), 523264   ;;  %s2266_s2 = sld [smem:[#allocation23_spill]] (!%p1544_p1)  ;;  %s2268_s21 = sld [smem:[#allocation25_spill]] (!%p1544_p1) }
  0x3a   : > { %1591 = vmatpush3.bf16.msra.mxu0 %v1730_v8  ;;  %v1732_v25 = vld [vmem:[%s2049_s28] sm:$0xff]  }
  0x3b   : > { %1592 = vmatprep.subr.bf16.mxu0 %v1845_v6  ;;  %v1537_v41 = vld [vmem:[%s734_s16] ss:$0 sm:$0xff]  ;;  %s2267_s16 = sld [smem:[#allocation24_spill]] (!%p1544_p1) }
  0x3c   : > { %1601 = vmatpush3.bf16.msra.mxu1 %v1729_v7  ;;  %v1058_v46 = vld [vmem:[%s2063_s25] sm:$0xf] }
  0x3d   : > { %1614 = vmatprep.subr.bf16.mxu1 %v1845_v6  ;;  %v1063_v47 = vsel %vm1012_vm4, %v1058_v46, 0  ;;  %v1056_v57 = vld [vmem:[#allocation2] sm:$0xff] }
  0x3e   : > { %1593 = vmatpush3.bf16.msra.mxu0 %v1731_v9  ;;  %v1545_v1 = vld [vmem:[%s2214_s9] ss:$0 sm:$0xff] (!%p1544_p1) }
  0x3f   : > { %1603 = vmatmul.mubr.msk.bf16.vlgmr.msra.gmra.mrb[0].mxu1 %vm773_vm2, %v743_v3  ;;  %1606 = vmatprep.subr.bf16.mxu0 %v1845_v6 }
  0x40   : > { %1616 = vmatprep.mubr.msk.bf16.mxu1 %vm1846_vm1, %v1845_v6 }
  0x41   : > { %1595 = vmatmul.mubr.msk.bf16.vlgmr.msra.gmra.mrb[0].mxu0 %vm773_vm2, %v741_v2 }
  0x42   : > { %1610 = vmatprep.mubr.msk.bf16.mxu0 %vm1846_vm1, %v1845_v6  ;;  %1607 = vmatpush3.bf16.msra.mxu0 %v1732_v25  ;;  %v1743_v25 = vld [vmem:[%s2219_s14 + $0x18] sm:$0xff] (!%p1544_p1)  }
  0x43   : > { %1608 = vmatprep.subr.bf16.mxu0 %v1845_v6 }
  0x46   : > { %1609 = vmatpush3.bf16.msra.mxu0 %v1733_v26  ;;  %v1548_v26 = vld [vmem:[%s2265_s30] ss:$0 sm:$0xff] (!%p1544_p1) }
  0x47   : > { %1620 = vmatprep.subr.bf16.mxu0 %v1845_v6 }
  0x49   : > { %1611 = vmatmul.mubr.msk.bf16.vlgmr.msra.gmra.mrb[4].mxu0 %vm773_vm2, %v743_v3 }
  0x4a   : > { %1622 = vmatprep.mubr.msk.bf16.mxu0 %vm1846_vm1, %v1845_v6 }
 0x112   : > { %v877_v11 = vpop.f32.mrb[0].mxu1 }
 0x113   : > { %v878_v12 = vadd.f32 %v1533_v10, %v877_v11  ;;  %v1604_v13 = vpop.f32.mrb[1].mxu1  ;;  %v1738_v10 = vld [vmem:[%s2217_s12] sm:$0xff] (!%p1544_p1)   ;;  %v1847_v11 = vmov (!%p1544_p1), 0.0  }
 0x114   : > { %v880_v14 = vpop.f32.mrb[2].mxu1  ;;  %v811_v16 = vpop.f32.mrb[0].mxu0  ;;  %v1741_v13 = vld [vmem:[%s2219_s14 + $0x8] sm:$0xff] (!%p1544_p1)  }
 0x115   : > { %v947_v17 = vpack.c.bf16 %v878_v12, %v878_v12  ;;  %v1605_v18 = vpop.f32.mrb[3].mxu1  ;;  %v1596_v19 = vpop.f32.mrb[1].mxu0  ;;  %v812_v22 = vadd.f32 %v1529_v15, %v811_v16  ;;  %v1740_v12 = vld [vmem:[%s2219_s14] sm:$0xff] (!%p1544_p1)  }
 0x116   : > { %v814_v20 = vpop.f32.mrb[2].mxu0  ;;  %v1546_v18 = vld [vmem:[%s2215_s10] ss:$0 sm:$0xff] (!%p1544_p1) }
 0x117   : > { %v953_v21 = vsel %vm948_vm3, %v947_v17, 0  ;;  %v1597_v23 = vpop.f32.mrb[3].mxu0  ;;  %v946_v24 = vpack.c.bf16 %v812_v22, %v812_v22  ;;  %v1547_v20 = vld [vmem:[%s2264_s1] ss:$0 sm:$0xff] (!%p1544_p1) }
 0x118   : > { %1615 = vmatpush3.bf16.xpose.msra.mxu1 %v953_v21 }
 0x119   : > { %1626 = vmatprep.subr.bf16.mxu1 %v1845_v6 }
 0x11c   : > { %v940_v38 = vpop.f32.mrb[4].mxu0 }
 0x11d   : > { %v1612_v39 = vpop.f32.mrb[5].mxu0  ;;  %v941_v43 = vadd.f32 %v1537_v41, %v940_v38 }
 0x11e   : > { %v943_v40 = vpop.f32.mrb[6].mxu0 }
 0x11f   : > { %1617 = vmatmul.mubr.msk.bf16.vlgmr.msra.gmra.mrb[4].mxu1 %vm948_vm3, %v946_v24  ;;  %v1613_v42 = vpop.f32.mrb[7].mxu0  ;;  %v1008_v44 = vpack.c.bf16 %v941_v43, %v941_v43  ;;  %v1742_v24 = vld [vmem:[%s2219_s14 + $0x10] sm:$0xff] (!%p1544_p1)  }
 0x120   : > { %1628 = vmatprep.mubr.msk.bf16.mxu1 %vm1846_vm1, %v1845_v6  ;;  %1627 = vmatpush3.bf16.msra.mxu1 %v1063_v47 }
 0x121   : > { %v1014_v45 = vsel %vm1012_vm4, %v1008_v44, 0  ;;  %1640 = vmatprep.subr.bf16.mxu1 (!%p1544_p1), %v1847_v11 }
 0x122   : > { %1621 = vmatpush3.bf16.msra.mxu0 %v1014_v45 }
 0x123   : > { %1632 = vmatprep.subr.bf16.mxu0 (!%p1544_p1), %v1847_v11 }
 0x1f2   : > { %v989_v27 = vpop.f32.mrb[4].mxu1 }
 0x1f3   : > { %v995_v28 = vmul.f32 0.35355338, %v989_v27  ;;  %v1618_v29 = vpop.f32.mrb[5].mxu1 }
 0x1f4   : > { %v992_v30 = vpop.f32.mrb[6].mxu1 }
 0x1f5   : > { %v1619_v31 = vpop.f32.mrb[7].mxu1  ;;  %v996_v32 = vsel %vm948_vm3, %v995_v28, -inf }
 0x1f6   : > { %997 = vmax.xlane.f32.xlu0 %v996_v32 }
 0x283   : > { %v998_v33 = vpop.xlane.xlu0 %997 }
 0x284   : > { %v999_v34 = vsub.f32 %v995_v28, %v998_v33 }
 0x286   : > { %v1000_v35 = vmul.f32 1.442695, %v999_v34  ;;  %v1552_v34 = vld [vmem:[%s2266_s2] ss:$0 sm:$0xff] (!%p1544_p1) }
 0x288   : > { %1734 = vpow2.f32 %v1000_v35 }
 0x292   : > { %v1735_v36 = vpop.eup %1734 }
 0x293   : > { %v1002_v37 = vsel %vm948_vm3, %v1735_v36, 0.0 }
 0x294   : > { %1003 = vadd.xlane.f32.xlu0 %v1002_v37 }
 0x321   : > { %v1004_v48 = vpop.xlane.xlu0 %1003 }
 0x322   : > { %1736 = vrcp.f32 %v1004_v48 }
 0x32c   : > { %v1737_v49 = vpop.eup %1736 }
 0x32d   : > { %v1006_v50 = vmul.f32 %v1737_v49, %v1735_v36 }
 0x32f   : > { %v1007_v51 = vpack.c.bf16 %v1006_v50, %v1006_v50 }
 0x331   : > { %1623 = vmatmul.mubr.msk.bf16.vlgmr.msra.gmra.mrb[8].mxu0 %vm948_vm3, %v1007_v51  ;;  %v1558_v51 = vld [vmem:[%s2267_s16] ss:$0 sm:$0xff] (!%p1544_p1) }
 0x332   : > { %1636 = vmatprep.mubr.msk.bf16.mxu0 (!%p1544_p1), %vm1848_vm5, %v1847_v11  ;;  %1633 = vmatpush3.bf16.msra.mxu0 (!%p1544_p1), %v1738_v10 }
 0x333   : > { %1634 = vmatprep.subr.bf16.mxu0 (!%p1544_p1), %v1847_v11 }
 0x404   : > { %v1050_v52 = vpop.f32.mrb[8].mxu0 }
 0x405   : > { %v1057_v53 = vpack.c.bf16 %v1050_v52, %v1050_v52  ;;  %v1624_v54 = vpop.f32.mrb[9].mxu0 }
 0x406   : > { %v1053_v55 = vpop.f32.mrb[10].mxu0 }
 0x407   : > { %v1625_v56 = vpop.f32.mrb[11].mxu0  ;;  %1629 = vmatmul.mubr.msk.bf16.vlgmr.msra.gmra.mrb[8].mxu1 %vm948_vm3, %v1057_v53  ;;  %v1559_v53 = vld [vmem:[%s2268_s21] ss:$0 sm:$0xff] (!%p1544_p1) }
 0x408   : > { %1648 = vmatprep.mubr.msk.bf16.mxu1 (!%p1544_p1), %vm1848_vm5, %v1847_v11  ;;  %1641 = vmatpush3.bf16.msra.mxu1 (!%p1544_p1), %v1740_v12 }
 0x409   : > { %1642 = vmatprep.subr.bf16.mxu1 (!%p1544_p1), %v1847_v11 }
 0x40c   : > { %1643 = vmatpush3.bf16.msra.mxu1 (!%p1544_p1), %v1741_v13 }
 0x40d   : > { %1644 = vmatprep.subr.bf16.mxu1 (!%p1544_p1), %v1847_v11 }
 0x410   : > { %1645 = vmatpush3.bf16.msra.mxu1 (!%p1544_p1), %v1742_v24 }
 0x411   : > { %1646 = vmatprep.subr.bf16.mxu1 (!%p1544_p1), %v1847_v11 }
 0x414   : > { %1647 = vmatpush3.bf16.msra.mxu1 (!%p1544_p1), %v1743_v25 }
 0x4d7   : > { %1110 = sbr.rel (%p1544_p1) target bundleno = 2320 (0x910), region = 100 }
 0x4da   : > { %v1099_v58 = vpop.f32.mrb[8].mxu1 }
 0x4db   : > { %v1105_v59 = vadd.f32 %v1099_v58, %v1056_v57  ;;  %v1630_v60 = vpop.f32.mrb[9].mxu1 }
 0x4dc   : > { %v1102_v61 = vpop.f32.mrb[10].mxu1 }
 0x4dd   : > { %1106 = vst.msk [vmem:[#allocation2] sm:$0xff] %vm773_vm2, %v1105_v59  ;;  %v1631_v62 = vpop.f32.mrb[11].mxu1 }
 0x4e4   : > { %v1111_v63 = vld [vmem:[#allocation2] sm:$0xff] }
 0x4e5   : > { %v1119_v2 = vadd.f32 %v1545_v1, %v1111_v63 }
 0x4e7   : > { %v1120_v3 = vadd.f32 %v1119_v2, %v2036_v0  ;;  %v1739_v0 = vld [vmem:[%s2217_s12 + $0x8] sm:$0xff]  }
 0x4e8   : > { %1635 = vmatpush3.bf16.msra.mxu0 %v1739_v0 }
 0x4e9   : > { %v1121_v4 = vsel %vm773_vm2, %v1120_v3, 0.0 }
 0x4ea   : > { %1122 = vadd.xlane.f32.xlu0 %v1121_v4 }
 0x577   : > { %v1123_v5 = vpop.xlane.xlu0 %1122 }
 0x578   : > { %v1125_v6 = vmul.f32 0.03125, %v1123_v5 }
 0x57a   : > { %v1126_v7 = vsub.f32 %v1120_v3, %v1125_v6 }
 0x57c   : > { %v1127_v8 = vmul.f32 %v1126_v7, %v1126_v7 }
 0x57e   : > { %v1128_v9 = vsel %vm773_vm2, %v1127_v8, 0.0 }
 0x57f   : > { %1129 = vadd.xlane.f32.xlu0 %v1128_v9 }
 0x60c   : > { %v1130_v14 = vpop.xlane.xlu0 %1129 }
 0x60d   : > { %v1131_v15 = vmul.f32 0.03125, %v1130_v14 }
 0x60f   : > { %v1133_v16 = vadd.f32 1e-05, %v1131_v15 }
 0x611   : > { %1744 = vrsqrt.f32 %v1133_v16 }
 0x61b   : > { %v1745_v17 = vpop.eup %1744 }
 0x61c   : > { %v1135_v19 = vmul.f32 %v1745_v17, %v1126_v7 }
 0x61e   : > { %v1142_v21 = vmul.f32 %v1546_v18, %v1135_v19 }
 0x620   : > { %v1150_v22 = vadd.f32 %v1547_v20, %v1142_v21 }
 0x622   : > { %v1151_v23 = vpack.c.bf16 %v1150_v22, %v1150_v22 }
 0x624   : > { %1637 = vmatmul.mubr.msk.bf16.vlgmr.msra.gmra.mrb[0].mxu0 %vm773_vm2, %v1151_v23 }
 0x6f7   : > { %v1212_v27 = vpop.f32.mrb[0].mxu0 }
 0x6f8   : > { %v1213_v28 = vadd.f32 %v1548_v26, %v1212_v27  ;;  %v1638_v29 = vpop.f32.mrb[1].mxu0 }
 0x6f9   : > { %v1215_v30 = vpop.f32.mrb[2].mxu0 }
 0x6fa   : > { %v1218_v31 = vmax.f32 %v1213_v28, 0.0  ;;  %v1639_v32 = vpop.f32.mrb[3].mxu0 }
 0x6fc   : > { %v1219_v33 = vpack.c.bf16 %v1218_v31, %v1218_v31 }
 0x6fe   : > { %1649 = vmatmul.mubr.msk.bf16.vlgmr.msra.gmra.mrb[0].mxu1 %vm1259_vm6, %v1219_v33 }
 0x7d1   : > { %v1297_v35 = vpop.f32.mrb[0].mxu1 }
 0x7d2   : > { %v1298_v36 = vadd.f32 %v1552_v34, %v1297_v35  ;;  %v1650_v37 = vpop.f32.mrb[1].mxu1 }
 0x7d3   : > { %v1300_v38 = vpop.f32.mrb[2].mxu1 }
 0x7d4   : > { %v1651_v39 = vpop.f32.mrb[3].mxu1  ;;  %v1303_v40 = vadd.f32 %v1298_v36, %v1150_v22 }
 0x7d6   : > { %v1304_v41 = vsel %vm773_vm2, %v1303_v40, 0.0 }
 0x7d7   : > { %1305 = vadd.xlane.f32.xlu1 %v1304_v41 }
 0x864   : > { %v1306_v42 = vpop.xlane.xlu1 %1305 }
 0x865   : > { %v1307_v43 = vmul.f32 0.03125, %v1306_v42 }
 0x867   : > { %v1308_v44 = vsub.f32 %v1303_v40, %v1307_v43 }
 0x869   : > { %v1309_v45 = vmul.f32 %v1308_v44, %v1308_v44 }
 0x86b   : > { %v1310_v46 = vsel %vm773_vm2, %v1309_v45, 0.0 }
 0x86c   : > { %1311 = vadd.xlane.f32.xlu1 %v1310_v46 }
 0x8f9   : > { %v1312_v47 = vpop.xlane.xlu1 %1311 }
 0x8fa   : > { %v1313_v48 = vmul.f32 0.03125, %v1312_v47 }
 0x8fc   : > { %v1315_v49 = vadd.f32 1e-05, %v1313_v48 }
 0x8fe   : > { %1746 = vrsqrt.f32 %v1315_v49 }
 0x908   : > { %v1747_v50 = vpop.eup %1746 }
 0x909   : > { %v1317_v52 = vmul.f32 %v1747_v50, %v1308_v44 }
 0x90b   : > { %v1324_v54 = vmul.f32 %v1558_v51, %v1317_v52 }
 0x90d   : > { %v1332_v55 = vadd.f32 %v1559_v53, %v1324_v54 }
 0x90f   : > { %1333 = vst.msk [vmem:[%s699_s23] sm:$0xff] %vm773_vm2, %v1332_v55 }
 0x910 PF: > { %s2269_s25 = sld [smem:[#allocation9_spill]]  ;;  %s2272_s29 = sld [smem:[#allocation26_spill]] }
 0x911   : > { %s2270_s24 = sld [smem:[#allocation7_spill]]  ;;  %s1349_s28 = sshll.u32 %s699_s23, 4  ;;  %s1350_s28 = int_to_ptr.vmem [resolvable:$true] %s1349_s28 }
 0x912   : > { %s1748_s20 = scalar_lea.vmem %s1350_s28, 128  ;;  %s1849_s22 = smov [#allocation3]  }
 0x913   : > { %p1749_p2 = scmp.ne.s32.totalorder %s1350_s28, %s1748_s20  ;;  %s1752_s15 = sshll.u32 %s1849_s22, 4  ;;  %s1753_s15 = int_to_ptr.vmem [resolvable:$false] %s1752_s15 }
 0x914   : > { %s1754_s16 = scalar_lea.vmem %s1753_s15, 256  ;;  %p1755_p6 = scmp.lt.s32.totalorder %s1350_s28, %s1753_s15 }
 0x915   : > { %p1750_p4 = pnand %p1749_p2, %p1994_p3  ;;  %p1756_p7 = scmp.lt.s32.totalorder %s1754_s16, %s1748_s20 }
 0x916   : > { %s1561_s13 = sshll.u32 %s2269_s25, 7  ;;  %s2273_s2 = smov %s2272_s29 }
 0x917   : > { %s2154_s27 = scalar_lea.hbm %s2272_s29, %s1561_s13  ;;  %s2274_s30 = sand.u32 1, %s2270_s24  }
 0x918   : > { %s1335_s0 = scalar_lea.sflag [#allocation4], %s2274_s30  ;;  %p1751_p5 = pneg %p1750_p4 }
 0x919   : > { %p1757_p8 = por %p1756_p7, %p1755_p6 }
 0x91b   : > { %p1758_p10 = pnand %p1757_p8, %p1751_p5 }
 0x91d   : > { %1761 = shalt.err (!%p1758_p10)
}
 0x91e   : > { %s1762_s19 = scalar_lea.hbm %s2154_s27, 128  ;;  %s1766_s11 = scalar_lea.hbm %s2273_s2, 256 }
 0x91f   : > { %p1763_p11 = scmp.ne.s32.totalorder %s2154_s27, %s1762_s19  ;;  %p1767_p0 = scmp.lt.u32.totalorder %s2154_s27, %s2273_s2 }
 0x920   : > { %p1768_p1 = scmp.lt.u32.totalorder %s1766_s11, %s1762_s19  ;;  %p1770_p4 = scmp.lt.u32.totalorder %s1762_s19, %s2154_s27 }
 0x921   : > { %p1764_p12 = pnand %p1763_p11, %p1994_p3 }
 0x922   : > { %p1769_p2 = por %p1768_p1, %p1767_p0 }
 0x923   : > { %p1765_p13 = pneg %p1764_p12 }
 0x924   : > { %p1771_p5 = por %p1770_p4, %p1769_p2 }
 0x926   : > { %p1772_p6 = pnand %p1771_p5, %p1765_p13 }
 0x928   : > { %1775 = shalt.err (!%p1772_p6)
}
 0x929   : > { %1652 = dma.vmem_to_hbm [thread:$0]  (%p1994_p3), %s1350_s28, 128, %s2154_s27, %s1335_s0  }
 0x92a PF: > { %s2275_s24 = sld [smem:[#allocation12_spill]]  ;;  %s2276_s13 = sld [smem:[#allocation6_spill]] }
 0x930   : > { %p1658_p7 = scmp.ge.s32.totalorder %s2275_s24, 2  ;;  %s1361_s17 = sand.u32 1, %s2276_s13  }
 0x931   : > { %s1362_s29 = scalar_lea.sflag [#allocation4], %s1361_s17 }
 0x932   : > { %p1655_p8 = pnand %p1658_p7, %p2004_p9 }
 0x934   : > { %1809 = dma.done.wait (!%p1655_p8), %s1362_s29, 128  }
 0x935   : > { %1811 = vsyncadd (!%p1655_p8), %s1362_s29, 4294967168  ;;  %s31_s20 = sadd.s32 1, %s2275_s24   ;;  %s2278_s27 = sld [smem:[#allocation7_spill]] }
 0x936   : > { %p28_p10 = scmp.ge.s32.totalorder %s31_s20, 10   ;;  %s2279_s28 = sld [smem:[#allocation8_spill]] }
 0x937   : > { %s2280_s29 = sld [smem:[#allocation17_spill]]  ;;  %s2281_s30 = sld [smem:[#allocation10_spill]] }
 0x938   : > { %s2282_s0 = sld [smem:[#allocation11_spill]]  ;;  %s2283_s19 = sld [smem:[#allocation13_spill]] }
 0x939   : > { %s2284_s1 = sld [smem:[#allocation15_spill]]  ;;  %30 = sbr.rel (!%p28_p10) target bundleno = 15 (0xf), region = 159 }
 0x940   :  { %1367 = vsyncpa [#allocation4], 1 }
 0x941   :  { %1369 = vsyncpa [#allocation4 + $0x1], 1 }

</bundles_post_ra>
